<compile_context>
chip_gen: v6e
topology: v6e:2x2x1
jax: 0.10.0
libtpu: 0.0.40
codegen_flags: <defaults>
</compile_context>

<pallas_src>
import jax
import jax.numpy as jnp
from jax.experimental import pallas as pl
from jax.experimental.pallas import tpu as pltpu


def _severity_ce_kernel(n_ref, logits_ref, targets_ref, cw_ref, out_ref):
    # (C, Nb) tile: classes on sublanes, examples on the 128-wide lane axis.
    logits = logits_ref[...].astype(jnp.float32)                     # (C, Nb)
    tgt = targets_ref[...]                                           # (1, Nb) i32
    cw = cw_ref[...].astype(jnp.float32)                             # (C, 1)
    c, nb = logits.shape

    class_ids = jax.lax.broadcasted_iota(jnp.int32, (c, nb), 0)      # (C, Nb)
    one_hot = (class_ids == tgt).astype(jnp.float32)                 # (C, Nb)

    # --- per-example cross entropy (log-sum-exp over the class/sublane axis) ---
    m = jnp.max(logits, axis=0, keepdims=True)                       # (1, Nb)
    sumexp = jnp.sum(jnp.exp(logits - m), axis=0, keepdims=True)     # (1, Nb)
    lse = m + jnp.log(sumexp)                                        # (1, Nb)
    tgt_logit = jnp.sum(one_hot * logits, axis=0, keepdims=True)     # (1, Nb)
    ce = lse - tgt_logit                                             # (1, Nb)
    w_t = jnp.sum(one_hot * cw, axis=0, keepdims=True)               # (1, Nb) w[y_i]

    # --- predicted severity = argmax over classes (lowest index on ties) ---
    is_max = logits == m
    idx_or_big = jnp.where(is_max, class_ids, jnp.int32(c))
    pred_idx = jnp.min(idx_or_big, axis=0, keepdims=True)            # (1, Nb)
    pred_sev = pred_idx.astype(jnp.float32)
    true_sev = tgt.astype(jnp.float32)

    diff = jnp.abs(true_sev - pred_sev)
    gt = (true_sev > pred_sev).astype(jnp.float32)
    # where(t>p, 2.5*(1+d), 1+d) == (1+d)*(1 + 1.5*(t>p))  -> select-free, exact
    penalty = (1.0 + diff) * (1.0 + 1.5 * gt)                        # (1, Nb)

    # --- mask the ragged last tile (no wrapper-side padding) -------------------
    # Columns >= n_total hold unspecified data; per-column reductions keep any
    # garbage confined to those columns, and jnp.where (a select, not 0*x)
    # replaces them with exact zeros before the lane reduction.
    col = (jax.lax.broadcasted_iota(jnp.int32, (1, nb), 1)
           + pl.program_id(0) * nb)
    valid = col < n_ref[0]                                           # (1, Nb) bool
    zero = jnp.zeros_like(ce)

    s_wce = jnp.sum(jnp.where(valid, w_t * ce, zero))   # sum_i w[y_i]*ce_i
    s_w = jnp.sum(jnp.where(valid, w_t, zero))          # sum_i w[y_i]
    s_pen = jnp.sum(jnp.where(valid, penalty, zero))    # sum_i penalty_i

    # Lane-dense partial-sum tile: sublane 0 -> s_wce, 1 -> s_w, 2+ -> s_pen.
    sub = jax.lax.broadcasted_iota(jnp.int32, (1, 8, 128), 1)
    out_ref[...] = jnp.where(sub == 0, s_wce, jnp.where(sub == 1, s_w, s_pen))


def _round_up(x, m):
    return ((x + m - 1) // m) * m


def severity_ce_class_major(logits_cm, targets, class_weights=None,
                            reduction="mean", block_n=65536):
    """Fast path: logits already class-major, shape (C, N). f32 or bf16."""
    c, n = logits_cm.shape
    if class_weights is None:
        cw = jnp.ones((c,), jnp.float32)
    else:
        cw = jnp.asarray(class_weights, jnp.float32)
    cw_2d = cw.reshape(c, 1)
    targets_2d = targets.astype(jnp.int32).reshape(1, n)
    n_arr = jnp.full((1,), n, dtype=jnp.int32)   # scalar-prefetched batch size

    # Example-tile width: multiple of 128 lanes; >= 2 tiles when N allows so the
    # "parallel" grid axis can occupy both v7x TensorCores.  65536-lane f32
    # tiles are ~2 MiB each (8-sublane padded), ~9 MiB total double-buffered:
    # within the 16 MiB v5e scoped-VMEM default and well under v6e/v7x limits.
    n_blk = min(block_n, max(128, _round_up((n + 1) // 2, 128)))
    n_blk = _round_up(n_blk, 128)
    num_tiles = (n + n_blk - 1) // n_blk

    itemsize = jnp.dtype(logits_cm.dtype).itemsize
    cost = pl.CostEstimate(
        flops=int(10 * n * c),
        transcendentals=int(n * (c + 1)),
        bytes_accessed=int(n * (c * itemsize + 4) + num_tiles * 8 * 128 * 4),
    )

    partials = pl.pallas_call(
        _severity_ce_kernel,
        out_shape=jax.ShapeDtypeStruct((num_tiles, 8, 128), jnp.float32),
        grid_spec=pltpu.PrefetchScalarGridSpec(
            num_scalar_prefetch=1,
            grid=(num_tiles,),
            in_specs=[
                pl.BlockSpec((c, n_blk), lambda i, n_ref: (0, i)),  # logits tile
                pl.BlockSpec((1, n_blk), lambda i, n_ref: (0, i)),  # targets tile
                pl.BlockSpec((c, 1), lambda i, n_ref: (0, 0)),      # class weights
            ],
            out_specs=pl.BlockSpec((1, 8, 128), lambda i, n_ref: (i, 0, 0)),
        ),
        compiler_params=pltpu.CompilerParams(
            dimension_semantics=("parallel",)),
        cost_estimate=cost,
    )(n_arr, logits_cm, targets_2d, cw_2d)

    s_wce = jnp.sum(partials[:, 0, 0])
    s_w = jnp.sum(partials[:, 1, 0])
    s_pen = jnp.sum(partials[:, 2, 0])

    ce_scalar = s_wce / s_w   # F.cross_entropy(..., weight=cw), reduction='mean'
    if reduction == "mean":
        return ce_scalar * (s_pen / jnp.float32(n))
    elif reduction == "sum":
        return ce_scalar * s_pen
    else:
        # TODO(synk): reduction=None (per-example loss vector) needs a per-example
        # output spec; only 'mean'/'sum' are lowered to the scalar-partials kernel.
        raise ValueError("reduction must be 'mean' or 'sum' for the Pallas kernel")


def severity_ce(logits, targets, class_weights=None, reduction="mean",
                block_n=65536):
    """logits: (N, C), targets: (N,) int, class_weights: (C,) or None -> scalar.

    One layout copy (transpose to class-major) remains for (N, C) callers; the
    input dtype (f32 or bf16) is preserved through it so bf16 logits halve the
    HBM traffic of both the transpose and the kernel read.
    """
    return severity_ce_class_major(jnp.transpose(logits), targets,
                                   class_weights=class_weights,
                                   reduction=reduction, block_n=block_n)


def _severity_ce_ref(logits, targets, class_weights=None, reduction="mean"):
    """Pure-JAX reference mirroring the PyTorch SeverityCE forward."""
    logits = logits.astype(jnp.float32)
    logp = jax.nn.log_softmax(logits, axis=1)
    ce_i = -jnp.take_along_axis(logp, targets[:, None], axis=1)[:, 0]
    if class_weights is None:
        ce = jnp.mean(ce_i)
    else:
        w = jnp.asarray(class_weights, jnp.float32)[targets]
        ce = jnp.sum(w * ce_i) / jnp.sum(w)
    pred = jnp.argmax(logits, axis=1).astype(jnp.float32)
    true = targets.astype(jnp.float32)
    diff = jnp.abs(true - pred)
    penalty = jnp.where(true > pred, 2.5 * (1.0 + diff), 1.0 + diff)
    loss = ce * penalty
    if reduction == "mean":
        return jnp.mean(loss)
    if reduction == "sum":
        return jnp.sum(loss)
    return loss


if __name__ == "__main__":
    key = jax.random.PRNGKey(0)
    k1, k2 = jax.random.split(key)

    # N=200 exercises a 2-tile grid with a ragged (masked) last tile; C=5 classes.
    N, C = 200, 5
    logits = jax.random.normal(k1, (N, C), dtype=jnp.float32)
    targets = jax.random.randint(k2, (N,), 0, C, dtype=jnp.int32)
    class_weights = jnp.linspace(0.5, 1.5, C, dtype=jnp.float32)

    # With per-class weights.
    out_w = jax.block_until_ready(severity_ce(logits, targets, class_weights))
    ref_w = _severity_ce_ref(logits, targets, class_weights)
    assert jnp.allclose(out_w, ref_w, rtol=1e-5, atol=1e-5), (out_w, ref_w)

    # Module default: class_weights=None.
    out_u = jax.block_until_ready(severity_ce(logits, targets, None))
    ref_u = _severity_ce_ref(logits, targets, None)
    assert jnp.allclose(out_u, ref_u, rtol=1e-5, atol=1e-5), (out_u, ref_u)

    # reduction='sum'.
    out_s = jax.block_until_ready(
        severity_ce(logits, targets, class_weights, reduction="sum"))
    ref_s = _severity_ce_ref(logits, targets, class_weights, reduction="sum")
    assert jnp.allclose(out_s, ref_s, rtol=1e-5, atol=1e-5), (out_s, ref_s)

    # Deliberately tied logits: argmax tie-break (lowest index) must match.
    logits_tied = logits.at[:, 2].set(logits[:, 1])
    out_t = jax.block_until_ready(severity_ce(logits_tied, targets, class_weights))
    ref_t = _severity_ce_ref(logits_tied, targets, class_weights)
    assert jnp.allclose(out_t, ref_t, rtol=1e-5, atol=1e-5), (out_t, ref_t)

    # bf16 logits path (halved DMA; in-kernel compute stays f32).
    logits_bf = logits.astype(jnp.bfloat16)
    out_b = jax.block_until_ready(severity_ce(logits_bf, targets, class_weights))
    ref_b = _severity_ce_ref(logits_bf, targets, class_weights)
    assert jnp.allclose(out_b, ref_b, rtol=2e-2, atol=2e-2), (out_b, ref_b)

    print("KERNEL_OK")
</pallas_src>

<mosaic_0001>
module attributes {stable_mosaic.version = 11 : i64} {
  func.func @_severity_ce_kernel(%arg0: i32, %arg1: memref<1xi32, #tpu.memory_space<smem>>, %arg2: memref<5x128xf32, #tpu.memory_space<vmem>>, %arg3: memref<1x128xi32, #tpu.memory_space<vmem>>, %arg4: memref<5x1xf32, #tpu.memory_space<vmem>>, %arg5: memref<1x8x128xf32, #tpu.memory_space<vmem>>) attributes {dimension_semantics = [#tpu.dimension_semantics<parallel>], iteration_bounds = array<i64: 2>, scalar_prefetch = 1 : i64, scratch_operands = 0 : i64, tpu.core_type = #tpu.core_type<tc>, window_params = [{transform_indices = @transform_0, window_bounds = array<i64: 5, 128>}, {transform_indices = @transform_1, window_bounds = array<i64: 1, 128>}, {pipeline_mode = #tpu.pipeline_mode<synchronous>, transform_indices = @transform_2, window_bounds = array<i64: 5, 1>}, {transform_indices = @transform_3, window_bounds = array<i64: 1, 8, 128>}]} {
    %c0 = arith.constant 0 : index
    %c0_0 = arith.constant 0 : index
    %0 = vector.load %arg2[%c0, %c0_0] : memref<5x128xf32, #tpu.memory_space<vmem>>, vector<5x128xf32>
    %c0_1 = arith.constant 0 : index
    %c0_2 = arith.constant 0 : index
    %1 = vector.load %arg3[%c0_1, %c0_2] : memref<1x128xi32, #tpu.memory_space<vmem>>, vector<1x128xi32>
    %c0_3 = arith.constant 0 : index
    %c0_4 = arith.constant 0 : index
    %2 = vector.load %arg4[%c0_3, %c0_4] : memref<5x1xf32, #tpu.memory_space<vmem>>, vector<5x1xf32>
    %3 = tpu.iota {dimensions = array<i32: 0>} : vector<5x128xi32>
    %4 = vector.broadcast %1 : vector<1x128xi32> to vector<5x128xi32>
    %5 = arith.cmpi eq, %3, %4 : vector<5x128xi32>
    %6 = arith.extui %5 : vector<5x128xi1> to vector<5x128xi32>
    %7 = arith.sitofp %6 : vector<5x128xi32> to vector<5x128xf32>
    %cst = arith.constant dense<0xFF800000> : vector<128xf32>
    %8 = vector.multi_reduction <maximumf>, %0, %cst [0] : vector<5x128xf32> to vector<128xf32>
    %9 = vector.shape_cast %8 : vector<128xf32> to vector<1x128xf32>
    %10 = vector.broadcast %9 : vector<1x128xf32> to vector<5x128xf32>
    %11 = arith.subf %0, %10 : vector<5x128xf32>
    %12 = math.exp %11 : vector<5x128xf32>
    %cst_5 = arith.constant dense<0.000000e+00> : vector<128xf32>
    %13 = vector.multi_reduction <add>, %12, %cst_5 [0] : vector<5x128xf32> to vector<128xf32>
    %14 = vector.shape_cast %13 : vector<128xf32> to vector<1x128xf32>
    %15 = math.log %14 : vector<1x128xf32>
    %16 = arith.addf %9, %15 : vector<1x128xf32>
    %17 = arith.mulf %7, %0 : vector<5x128xf32>
    %cst_6 = arith.constant dense<0.000000e+00> : vector<128xf32>
    %18 = vector.multi_reduction <add>, %17, %cst_6 [0] : vector<5x128xf32> to vector<128xf32>
    %19 = vector.shape_cast %18 : vector<128xf32> to vector<1x128xf32>
    %20 = arith.subf %16, %19 : vector<1x128xf32>
    %21 = vector.broadcast %2 : vector<5x1xf32> to vector<5x128xf32>
    %22 = arith.mulf %7, %21 : vector<5x128xf32>
    %cst_7 = arith.constant dense<0.000000e+00> : vector<128xf32>
    %23 = vector.multi_reduction <add>, %22, %cst_7 [0] : vector<5x128xf32> to vector<128xf32>
    %24 = vector.shape_cast %23 : vector<128xf32> to vector<1x128xf32>
    %25 = vector.broadcast %9 : vector<1x128xf32> to vector<5x128xf32>
    %26 = arith.cmpf oeq, %0, %25 : vector<5x128xf32>
    %c5_i32 = arith.constant 5 : i32
    %27 = vector.broadcast %c5_i32 : i32 to vector<5x128xi32>
    %28 = arith.select %26, %3, %27 : vector<5x128xi1>, vector<5x128xi32>
    %cst_8 = arith.constant dense<2147483647> : vector<128xi32>
    %29 = vector.multi_reduction <minsi>, %28, %cst_8 [0] : vector<5x128xi32> to vector<128xi32>
    %30 = vector.shape_cast %29 : vector<128xi32> to vector<1x128xi32>
    %31 = arith.sitofp %30 : vector<1x128xi32> to vector<1x128xf32>
    %32 = arith.sitofp %1 : vector<1x128xi32> to vector<1x128xf32>
    %33 = arith.subf %32, %31 : vector<1x128xf32>
    %34 = math.absf %33 : vector<1x128xf32>
    %35 = arith.cmpf ogt, %32, %31 : vector<1x128xf32>
    %36 = arith.extui %35 : vector<1x128xi1> to vector<1x128xi32>
    %37 = arith.sitofp %36 : vector<1x128xi32> to vector<1x128xf32>
    %cst_9 = arith.constant 1.000000e+00 : f32
    %38 = vector.broadcast %cst_9 : f32 to vector<1x128xf32>
    %39 = arith.addf %38, %34 : vector<1x128xf32>
    %cst_10 = arith.constant 1.500000e+00 : f32
    %40 = vector.broadcast %cst_10 : f32 to vector<1x128xf32>
    %41 = arith.mulf %40, %37 : vector<1x128xf32>
    %cst_11 = arith.constant 1.000000e+00 : f32
    %42 = vector.broadcast %cst_11 : f32 to vector<1x128xf32>
    %43 = arith.addf %42, %41 : vector<1x128xf32>
    %44 = arith.mulf %39, %43 : vector<1x128xf32>
    %45 = tpu.iota {dimensions = array<i32: 1>} : vector<1x128xi32>
    %c128_i32 = arith.constant 128 : i32
    %46 = arith.muli %arg0, %c128_i32 : i32
    %47 = vector.broadcast %46 : i32 to vector<1x128xi32>
    %48 = arith.addi %45, %47 : vector<1x128xi32>
    %c0_12 = arith.constant 0 : index
    %49 = memref.load %arg1[%c0_12] : memref<1xi32, #tpu.memory_space<smem>>
    %50 = vector.broadcast %49 : i32 to vector<1x128xi32>
    %51 = arith.cmpi slt, %48, %50 : vector<1x128xi32>
    %cst_13 = arith.constant 0.000000e+00 : f32
    %52 = vector.broadcast %cst_13 : f32 to vector<1x128xf32>
    %53 = arith.mulf %24, %20 : vector<1x128xf32>
    %54 = arith.select %51, %53, %52 : vector<1x128xi1>, vector<1x128xf32>
    %55 = vector.shape_cast %54 : vector<1x128xf32> to vector<1x1x128xf32>
    %cst_14 = arith.constant dense<0.000000e+00> : vector<1xf32>
    %56 = vector.multi_reduction <add>, %55, %cst_14 [1, 2] : vector<1x1x128xf32> to vector<1xf32>
    %57 = vector.shape_cast %56 : vector<1xf32> to vector<1x1x1xf32>
    %58 = vector.extract %57[0, 0, 0] : f32 from vector<1x1x1xf32>
    %59 = arith.select %51, %24, %52 : vector<1x128xi1>, vector<1x128xf32>
    %60 = vector.shape_cast %59 : vector<1x128xf32> to vector<1x1x128xf32>
    %cst_15 = arith.constant dense<0.000000e+00> : vector<1xf32>
    %61 = vector.multi_reduction <add>, %60, %cst_15 [1, 2] : vector<1x1x128xf32> to vector<1xf32>
    %62 = vector.shape_cast %61 : vector<1xf32> to vector<1x1x1xf32>
    %63 = vector.extract %62[0, 0, 0] : f32 from vector<1x1x1xf32>
    %64 = arith.select %51, %44, %52 : vector<1x128xi1>, vector<1x128xf32>
    %65 = vector.shape_cast %64 : vector<1x128xf32> to vector<1x1x128xf32>
    %cst_16 = arith.constant dense<0.000000e+00> : vector<1xf32>
    %66 = vector.multi_reduction <add>, %65, %cst_16 [1, 2] : vector<1x1x128xf32> to vector<1xf32>
    %67 = vector.shape_cast %66 : vector<1xf32> to vector<1x1x1xf32>
    %68 = vector.extract %67[0, 0, 0] : f32 from vector<1x1x1xf32>
    %69 = tpu.iota {dimensions = array<i32: 1>} : vector<1x8x128xi32>
    %c0_i32 = arith.constant 0 : i32
    %70 = vector.broadcast %c0_i32 : i32 to vector<1x8x128xi32>
    %71 = arith.cmpi eq, %69, %70 : vector<1x8x128xi32>
    %c1_i32 = arith.constant 1 : i32
    %72 = vector.broadcast %c1_i32 : i32 to vector<1x8x128xi32>
    %73 = arith.cmpi eq, %69, %72 : vector<1x8x128xi32>
    %74 = vector.broadcast %63 : f32 to vector<1x8x128xf32>
    %75 = vector.broadcast %68 : f32 to vector<1x8x128xf32>
    %76 = arith.select %73, %74, %75 : vector<1x8x128xi1>, vector<1x8x128xf32>
    %77 = vector.broadcast %58 : f32 to vector<1x8x128xf32>
    %78 = arith.select %71, %77, %76 : vector<1x8x128xi1>, vector<1x8x128xf32>
    %c0_17 = arith.constant 0 : index
    %c0_18 = arith.constant 0 : index
    %c0_19 = arith.constant 0 : index
    %79 = vector.load %arg5[%c0_17, %c0_18, %c0_19] : memref<1x8x128xf32, #tpu.memory_space<vmem>>, vector<1x8x128xf32>
    tpu.vector_store %arg5[%c0_17, %c0_18, %c0_19], %78 {strides = array<i32>} : memref<1x8x128xf32, #tpu.memory_space<vmem>>, vector<1x8x128xf32>,
    return
  }
  func.func @transform_0(%arg0: i32, %arg1: memref<1xi32, #tpu.memory_space<smem>>) -> (i32, i32) {
    %c0_i32 = arith.constant 0 : i32
    %c0_i32_0 = arith.constant 0 : i32
    return %c0_i32, %arg0 : i32, i32
  }
  func.func @transform_1(%arg0: i32, %arg1: memref<1xi32, #tpu.memory_space<smem>>) -> (i32, i32) {
    %c0_i32 = arith.constant 0 : i32
    %c0_i32_0 = arith.constant 0 : i32
    return %c0_i32, %arg0 : i32, i32
  }
  func.func @transform_2(%arg0: i32, %arg1: memref<1xi32, #tpu.memory_space<smem>>) -> (i32, i32) {
    %c0_i32 = arith.constant 0 : i32
    %c0_i32_0 = arith.constant 0 : i32
    %c0_i32_1 = arith.constant 0 : i32
    return %c0_i32, %c0_i32_0 : i32, i32
  }
  func.func @transform_3(%arg0: i32, %arg1: memref<1xi32, #tpu.memory_space<smem>>) -> (i32, i32, i32) {
    %c0_i32 = arith.constant 0 : i32
    %c0_i32_0 = arith.constant 0 : i32
    %c0_i32_1 = arith.constant 0 : i32
    return %arg0, %c0_i32, %c0_i32_0 : i32, i32, i32
  }
}

</mosaic_0001>

<bundles_post_ra>
// kernel: tpu_custom_call.1
= control target key start
LH: loop header
LB: loop body
LE: loop exit
PB: predicated region body
PF: predicated region fallthrough
CT: control target
= control target key end

     0   :  { %s804_s0 = inlined_call_operand.<no memory space> [shape: s32[1], index: 0, kind: input, shape index: {}]   ;;  %s805_s1 = inlined_call_operand.hbm [shape: f32[5,200], index: 1, kind: input, shape index: {}]   ;;  %s806_s2 = inlined_call_operand.vmem [shape: s32[1,200], index: 2, kind: input, shape index: {}]   ;;  %s807_s3 = inlined_call_operand.vmem [shape: f32[5,1], index: 3, kind: input, shape index: {}]   ;;  %s808_s4 = inlined_call_operand.hbm [shape: f32[2,8,128], index: 4, kind: output, shape index: {}]  }
   0x1   :  { %9 = sst [smem:[#allocation3]] %s804_s0 }
   0x2   :  { %10 = vsyncpa [#allocation5], 0 }
   0x3   :  { %12 = vsyncpa [#allocation5 + $0x1], 0 }
   0x4   :  { %13 = vsyncpa [#allocation6], 0 }
   0x5   :  { %15 = vsyncpa [#allocation6 + $0x1], 0  ;;  %s624_s17 = smov 0   ;;  %s626_s18 = smov 0  }
   0x6   :  { %s628_s19 = smov 0   ;;  %s630_s20 = smov 0  }
   0x7 LB: > { %s645_s0 = sadd.s32 4294967295, %s590_s20   ;;  %s424_s21 = sadd.s32 4294967294, %s590_s20   ;;  %s590_s20 = sphi %s630_s20, %s825_s20   ;;  %s586_s19 = sphi %s628_s19, %s824_s19   ;;  %s582_s18 = sphi %s626_s18, %s823_s18   ;;  %s578_s17 = sphi %s624_s17, %s822_s17  }
   0x8   : > { %s649_s22 = sadd.s32 1, %s590_s20   ;;  %s28_s23 = sadd.s32 1, %s586_s19 }
   0x9   : > { %s25_s24 = ssub.s32 %s590_s20, %s649_s22  ;;  %p35_p0 = scmp.ne.s32.totalorder %s586_s19, %s582_s18 }
   0xa   : > { %p26_p1 = scmp.eq.s32.totalorder %s25_s24, 0  ;;  %p36_p2 = scmp.eq.s32.totalorder %s590_s20, 0 }
   0xb   : > { %p41_p3 = scmp.ne.s32.totalorder %s582_s18, %s578_s17  ;;  %p42_p4 = scmp.eq.s32.totalorder %s645_s0, 0 }
   0xc   : > { %s661_s25 = scalar_select %p26_p1, %s586_s19, %s28_s23  }
   0xd   : > { %p663_p5 = por %p36_p2, %p35_p0  ;;  %p667_p6 = por %p42_p4, %p41_p3 }
   0xe   : > { %p112_p7 = scmp.eq.s32.totalorder %s645_s0, 1  ;;  %p118_p8 = scmp.eq.s32.totalorder %s424_s21, 1 }
   0xf   : > { %s812_s27 = scalar_select %p667_p6, 1, 0 }
  0x10   : > { %p457_p10 = scmp.lt.s32.totalorder %s590_s20, 2  ;;  %p674_p11 = por %p112_p7, %p35_p0 }
  0x11   : > { %p678_p12 = por %p118_p8, %p41_p3  ;;  %s141_s30 = sand.u32 1, %s586_s19  }
  0x12   : > { %s813_s28 = scalar_select %p674_p11, 1, 0 }
  0x13   : > { %s814_s29 = scalar_select %p678_p12, 1, 0 }
  0x14   : > { %s428_s5 = sshll.u32 %s590_s20, 7  ;;  %s427_s6 = sshll.u32 %s141_s30, 3 }
  0x15   : > { %s687_s9 = scalar_lea.hbm %s805_s1, %s428_s5  ;;  %s145_s10 = scalar_lea.vmem [#allocation4], %s427_s6 }
  0x16   : > { %s152_s11 = sshll.u32 %s145_s10, 4  ;;  %p691_p13 = pnand %p457_p10, %p663_p5  ;;  %s695_s11 = int_to_ptr.vmem [resolvable:$true] %s152_s11 }
  0x17   : > { %s142_s13 = scalar_lea.sflag [#allocation5], %s141_s30  ;;  %s498_s14 = scalar_lea.hbm %s687_s9, 128 }
  0x18   : > { %p499_p2 = scmp.ne.s32.totalorder %s687_s9, %s498_s14  ;;  %p500_p3 = pneg %p691_p13 }
  0x19   : > { %s503_s21 = scalar_lea.hbm %s805_s1, 256  ;;  %p504_p5 = scmp.lt.s32.totalorder %s687_s9, %s805_s1 }
  0x1a   : > { %p501_p4 = pnand %p500_p3, %p499_p2  ;;  %p505_p8 = scmp.lt.s32.totalorder %s503_s21, %s498_s14 }
  0x1c   : > { %p502_p7 = pneg %p501_p4  ;;  %p506_p10 = por %p505_p8, %p504_p5 }
  0x1e   : > { %p507_p9 = pnand %p506_p10, %p502_p7 }
  0x20   : > { %510 = shalt.err (!%p507_p9)
}
  0x21   : > { %s511_s26 = scalar_lea.vmem %s695_s11, 128  ;;  %s592_s30 = smov [#allocation4]  }
  0x22   : > { %p512_p0 = scmp.ne.s32.totalorder %s695_s11, %s511_s26  ;;  %s516_s5 = sshll.u32 %s592_s30, 4  ;;  %s517_s5 = int_to_ptr.vmem [resolvable:$false] %s516_s5 }
  0x23   : > { %s518_s6 = scalar_lea.vmem %s517_s5, 256  ;;  %p519_p4 = scmp.lt.s32.totalorder %s695_s11, %s517_s5 }
  0x24   : > { %p514_p1 = pnand %p512_p0, %p500_p3  ;;  %p520_p12 = scmp.lt.s32.totalorder %s518_s6, %s511_s26 }
  0x26   : > { %p515_p2 = pneg %p514_p1  ;;  %p521_p11 = por %p520_p12, %p519_p4 }
  0x28   : > { %p522_p6 = pnand %p521_p11, %p515_p2 }
  0x2a   : > { %525 = shalt.err (!%p522_p6)
}
  0x2b   : > { %452 = dma.hbm_to_vmem [thread:$0]  (!%p691_p13), %s687_s9, 128, %s695_s11, %s142_s13  }
  0x2c   : > { %p816_p9 = scmp.lt.s32.totalorder %s590_s20, 3  ;;  %p817_p7 = scmp.ge.s32.totalorder %s590_s20, 1 }
  0x2e   : > { %p164_p0 = pnand %p817_p7, %p816_p9 }
  0x2f   : > { %s722_s7 = sand.u32 (!%p164_p0), 1, %s582_s18   ;;  %p818_p6 = scmp.ne.s32.totalorder (!%p164_p0), %s812_s27, 0 }
  0x30   : > { %167 = sbr.rel (%p164_p0) target bundleno = 417 (0x1a1), region = 32  ;;  %s430_s8 = sshll.u32 (!%p164_p0), %s722_s7, 3 }
  0x31   : > { %s170_s10 = scalar_lea.sflag (!%p164_p0), [#allocation5], %s722_s7  ;;  %s173_s12 = scalar_lea.vmem (!%p164_p0), [#allocation4], %s430_s8 }
  0x35   : > { %569 = dma.done.wait (%p818_p6), %s170_s10, 128  }
  0x36   : > { %571 = vsyncadd (%p818_p6), %s170_s10, 4294967168  ;;  %v593_v0 = vmov 0   ;;  %v204_v1 = vld [vmem:[%s807_s3] sm:$0x1f]  ;;  %vm214_vm0 = vcmask 1044480   ;;  %v205_v12 = vlaneseq  ;;  %p199_p11 = scmp.lt.s32.totalorder %s645_s0, 1 }
  0x37   : > { %493 = vset.pattern.permute.xlu0 %v593_v0  ;;  %v202_v2 = vld [vmem:[%s173_s12] sm:$0x1f]  ;;  %v594_v28 = vmov 0.0   ;;  %s285_s16 = sld [smem:[#allocation3]]  ;;  %s434_s21 = sshll.u32 %s645_s0, 7  ;;  %vm290_vm8 = vcmask 1040384  }
  0x38   : > { %246 = vperm.xlu0 %493, %v204_v1   ;;  %v215_v3 = vsel %vm214_vm0, %v202_v2, -inf  ;;  %v741_v13 = vshrl.u32 %v205_v12, 7  ;;  %s200_s27 = scalar_select %p199_p11, %s645_s0, 1  ;;  %v281_v54 = vand.u32 127, %v205_v12  ;;  %v283_v56 = vstv %s434_s21 }
  0x39   : > { %v216_v4 = vrot.slane %v215_v3, 4  ;;  %s198_s26 = scalar_lea.vmem [#allocation7], %s430_s8  ;;  %s767_s12 = scalar_lea.hbm %s808_s4, %s434_s21 }
  0x3a   : > { %s201_s15 = scalar_lea.vmem %s806_s2, %s200_s27  ;;  %v209_v20 = vsub.s32 0, %v741_v13  ;;  %v284_v62 = vadd.s32 %v283_v56, %v281_v54  ;;  %vm324_vm9 = vcmp.eq.s32.totalorder %v741_v13, 1  ;;  %s345_s30 = sshll.u32 %s198_s26, 4  ;;  %vm323_vm10 = vcmp.eq.s32.totalorder %v741_v13, 0  ;;  %s346_s30 = int_to_ptr.vmem [resolvable:$true] %s345_s30 }
  0x3b   : > { %v217_v5 = vmax.f32 %v215_v3, %v216_v4  ;;  %v203_v21 = vld [vmem:[%s201_s15] sm:$0x1]  ;;  %s332_s9 = scalar_lea.sflag [#allocation6], %s722_s7  ;;  %s526_s11 = scalar_lea.vmem %s346_s30, 128 }
  0x3c   : > { %v210_v23 = vrot.slane %v203_v21, %v209_v20  ;;  %v270_v40 = vcvt.s32.f32 %v203_v21  ;;  %p527_p12 = scmp.ne.s32.totalorder %s346_s30, %s526_s11  ;;  %p819_p13 = scmp.ne.s32.totalorder %s813_s28, 0 }
  0x3d   : > { %v218_v6 = vrot.slane %v217_v5, 2  ;;  %v286_v0 = vstv %s285_s16  ;;  %s595_s8 = smov [#allocation7]  }
  0x3e   : > { %vm211_vm3 = vcmp.eq.s32.totalorder %v741_v13, %v210_v23  ;;  %vm287_vm7 = vcmp.lt.s32.totalorder %v284_v62, %v286_v0  ;;  %p528_p1 = pnand %p527_p12, %p819_p13  ;;  %s530_s27 = sshll.u32 %s595_s8, 4  ;;  %s531_s27 = int_to_ptr.vmem [resolvable:$false] %s530_s27 }
  0x3f   : > { %v219_v7 = vmax.f32 %v217_v5, %v218_v6  ;;  %v432_v29 = vsel %vm211_vm3, 1.0, %v594_v28  ;;  %s532_s13 = scalar_lea.vmem %s531_s27, 256  ;;  %p533_p5 = scmp.lt.s32.totalorder %s346_s30, %s531_s27 }
  0x40   : > { %v235_v30 = vmul.f32 %v432_v29, %v202_v2  ;;  %p529_p3 = pneg %p528_p1  ;;  %p534_p8 = scmp.lt.s32.totalorder %s532_s13, %s526_s11 }
  0x41   : > { %v220_v8 = vrot.slane %v219_v7, 1 }
  0x42   : > { %v236_v33 = vsel %vm214_vm0, %v235_v30, 0.0  ;;  %p535_p10 = por %p534_p8, %p533_p5 }
  0x43   : > { %v736_v9 = vmax.f32 %v219_v7, %v220_v8  ;;  %v237_v36 = vrot.slane %v236_v33, 4 }
  0x44   : > { %p536_p2 = pnand %p535_p10, %p529_p3 }
  0x45   : > { %v222_v10 = vsub.f32 %v202_v2, %v736_v9  ;;  %vm257_vm1 = vcmp.eq.f32.partialorder %v202_v2, %v736_v9  ;;  %v238_v37 = vadd.f32 %v237_v36, %v236_v33 }
  0x46   : > { %v258_v15 = vsel %vm257_vm1, %v741_v13, 5 }
  0x47   : > { %v223_v11 = vmul.f32 1.442695, %v222_v10  ;;  %v259_v17 = vsel %vm214_vm0, %v258_v15, 2147483647  ;;  %v239_v41 = vrot.slane %v238_v37, 2 }
  0x48   : > { %v260_v19 = vrot.slane %v259_v17, 4 }
  0x49   : > { %494 = vpow2.f32 %v223_v11  ;;  %v240_v42 = vadd.f32 %v239_v41, %v238_v37 }
  0x4a   : > { %vm261_vm2 = vcmp.lt.s32.totalorder %v259_v17, %v260_v19 }
  0x4b   : > { %v262_v24 = vsel %vm261_vm2, %v259_v17, %v260_v19  ;;  %v241_v49 = vrot.slane %v240_v42, 1 }
  0x4c   : > { %v263_v26 = vrot.slane %v262_v24, 2 }
  0x4d   : > { %v242_v57 = vadd.f32 %v241_v49, %v240_v42 }
  0x4e   : > { %vm264_vm4 = vcmp.lt.s32.totalorder %v262_v24, %v263_v26 }
  0x4f   : > { %v265_v32 = vsel %vm264_vm4, %v262_v24, %v263_v26 }
  0x50   : > { %v266_v34 = vrot.slane %v265_v32, 1 }
  0x52   : > { %vm267_vm5 = vcmp.lt.s32.totalorder %v265_v32, %v266_v34 }
  0x53   : > { %v268_v38 = vsel %vm267_vm5, %v265_v32, %v266_v34 }
  0x54   : > { %v269_v39 = vcvt.s32.f32 %v268_v38 }
  0x56   : > { %v495_v14 = vpop.eup %494  ;;  %vm273_vm6 = vcmp.gt.f32.partialorder %v270_v40, %v269_v39  ;;  %v271_v44 = vsub.f32 %v270_v40, %v269_v39 }
  0x57   : > { %v225_v16 = vsel %vm214_vm0, %v495_v14, 0.0  ;;  %v433_v47 = vsel %vm273_vm6, 1.0, %v594_v28 }
  0x58   : > { %v226_v18 = vrot.slane %v225_v16, 4  ;;  %v277_v51 = vmul.f32 1.5, %v433_v47  ;;  %v272_v53 = vand.u32 2147483647, %v271_v44 }
  0x5a   : > { %v227_v22 = vadd.f32 %v226_v18, %v225_v16  ;;  %v278_v59 = vadd.f32 1.0, %v277_v51  ;;  %v276_v61 = vadd.f32 1.0, %v272_v53 }
  0x5c   : > { %v228_v25 = vrot.slane %v227_v22, 2  ;;  %v279_v3 = vmul.f32 %v278_v59, %v276_v61 }
  0x5e   : > { %v229_v27 = vadd.f32 %v228_v25, %v227_v22  ;;  %v312_v7 = vsel %vm287_vm7, %v279_v3, 0.0 }
  0x5f   : > { %v313_v12 = vsel %vm290_vm8, %v312_v7, 0.0 }
  0x60   : > { %v230_v31 = vrot.slane %v229_v27, 1 }
  0x62   : > { %v231_v35 = vadd.f32 %v230_v31, %v229_v27 }
  0x64   : > { %496 = vlog2.f32 %v231_v35 }
  0x71   : > { %v497_v45 = vpop.eup %496 }
  0x72   : > { %v233_v52 = vmul.f32 0.6931472, %v497_v45 }
  0x74   : > { %v234_v60 = vadd.f32 %v233_v52, %v736_v9 }
  0x76   : > { %v243_v2 = vsub.f32 %v234_v60, %v242_v57 }
  0xb3   : > { %v247_v43 = vpop.permute.xlu0 %246 }
  0xb4   : > { %v249_v46 = vmul.f32 %v432_v29, %v247_v43 }
  0xb6   : > { %v250_v48 = vsel %vm214_vm0, %v249_v46, 0.0 }
  0xb7   : > { %v251_v50 = vrot.slane %v250_v48, 4 }
  0xb9   : > { %v252_v55 = vadd.f32 %v251_v50, %v250_v48 }
  0xbb   : > { %v253_v58 = vrot.slane %v252_v55, 2 }
  0xbd   : > { %v254_v63 = vadd.f32 %v253_v58, %v252_v55 }
  0xbf   : > { %v255_v1 = vrot.slane %v254_v63, 1 }
  0xc1   : > { %v256_v4 = vadd.f32 %v255_v1, %v254_v63 }
  0xc3   : > { %v301_v5 = vsel %vm287_vm7, %v256_v4, 0.0  ;;  %v288_v6 = vmul.f32 %v256_v4, %v243_v2 }
  0xc4   : > { %v302_v8 = vsel %vm290_vm8, %v301_v5, 0.0 }
  0xc5   : > { %303 = vadd.xlane.f32.xlu1 %v302_v8  ;;  %v289_v10 = vsel %vm287_vm7, %v288_v6, 0.0 }
  0xc6   : > { %v291_v11 = vsel %vm290_vm8, %v289_v10, 0.0 }
  0xc7   : > { %292 = vadd.xlane.f32.xlu0 %v291_v11 }
  0xc9   : > { %314 = vadd.xlane.f32.xlu1 %v313_v12 }
 0x14e   : > { %v304_v9 = vpop.xlane.xlu1 %303 }
 0x14f   : > { %v305_v14 = vrot.slane %v304_v9, 4 }
 0x150   : > { %v293_v15 = vpop.xlane.xlu0 %292 }
 0x151   : > { %v306_v16 = vadd.f32 %v305_v14, %v304_v9  ;;  %v294_v17 = vrot.slane %v293_v15, 4 }
 0x152   : > { %v315_v18 = vpop.xlane.xlu1 %314 }
 0x153   : > { %v307_v19 = vrot.slane %v306_v16, 2  ;;  %v295_v20 = vadd.f32 %v294_v17, %v293_v15  ;;  %v316_v21 = vrot.slane %v315_v18, 4 }
 0x155   : > { %v296_v22 = vrot.slane %v295_v20, 2  ;;  %v317_v23 = vadd.f32 %v316_v21, %v315_v18  ;;  %v308_v24 = vadd.f32 %v307_v19, %v306_v16 }
 0x157   : > { %v318_v25 = vrot.slane %v317_v23, 2  ;;  %v297_v26 = vadd.f32 %v296_v22, %v295_v20  ;;  %v309_v27 = vrot.slane %v308_v24, 1 }
 0x159   : > { %v319_v28 = vadd.f32 %v318_v25, %v317_v23  ;;  %v298_v29 = vrot.slane %v297_v26, 1  ;;  %v310_v32 = vadd.f32 %v309_v27, %v308_v24 }
 0x15b   : > { %v299_v30 = vadd.f32 %v298_v29, %v297_v26  ;;  %v320_v31 = vrot.slane %v319_v28, 1 }
 0x15d   : > { %439 = vpush %v299_v30  ;;  %v321_v33 = vadd.f32 %v320_v31, %v319_v28 }
 0x15e   : > { %441 = vpush %v310_v32 }
 0x15f   : > { %443 = vpush %v321_v33 }
 0x18e   : > { %s440_s23 = spop %439 }
 0x18f   : > { %s442_s24 = spop %441  ;;  %v328_v36 = vstv %s440_s23 }
 0x190   : > { %s444_s5 = spop %443  ;;  %v325_v34 = vstv %s442_s24 }
 0x191   : > { %v326_v35 = vstv %s444_s5 }
 0x192   : > { %v327_v37 = vsel %vm324_vm9, %v325_v34, %v326_v35 }
 0x193   : > { %v329_v38 = vsel %vm323_vm10, %v328_v36, %v327_v37 }
 0x194   : > { %330 = vst [vmem:[%s198_s26] sm:$0xff] %v329_v38 }
 0x195   : > { %539 = shalt.err (!%p536_p2)
}
 0x196   : > { %s540_s0 = scalar_lea.hbm %s767_s12, 128  ;;  %s544_s15 = scalar_lea.hbm %s808_s4, 256 }
 0x197   : > { %p541_p4 = scmp.ne.s32.totalorder %s767_s12, %s540_s0  ;;  %p545_p0 = scmp.lt.s32.totalorder %s767_s12, %s808_s4 }
 0x198   : > { %p546_p6 = scmp.lt.s32.totalorder %s544_s15, %s540_s0 }
 0x199   : > { %p542_p9 = pnand %p541_p4, %p819_p13 }
 0x19a   : > { %p547_p11 = por %p546_p6, %p545_p0 }
 0x19b   : > { %p543_p7 = pneg %p542_p9 }
 0x19d   : > { %p548_p12 = pnand %p547_p11, %p543_p7 }
 0x19f   : > { %551 = shalt.err (!%p548_p12)
}
 0x1a0   : > { %447 = dma.vmem_to_hbm [thread:$0]  (%p819_p13), %s346_s30, 128, %s767_s12, %s332_s9  }
 0x1a1 PF: > { %s357_s23 = sand.u32 1, %s578_s17   ;;  %p820_p1 = scmp.ne.s32.totalorder %s814_s29, 0 }
 0x1a2   : > { %p821_p3 = scmp.ge.s32.totalorder %s590_s20, 2  ;;  %s358_s24 = scalar_lea.sflag [#allocation6], %s357_s23 }
 0x1a4   : > { %p454_p5 = pnand %p821_p3, %p820_p1 }
 0x1a6   : > { %p455_p8 = pneg %p454_p5 }
 0x1a8   : > { %573 = dma.done.wait (%p455_p8), %s358_s24, 128  }
 0x1a9   : > { %575 = vsyncadd (%p455_p8), %s358_s24, 4294967168  ;;  %p18_p10 = scmp.ge.s32.totalorder %s649_s22, 4   ;;  %s822_s17 = smov %s582_s18 }
 0x1aa   : > { %s823_s18 = smov %s586_s19  ;;  %s824_s19 = smov %s661_s25 }
 0x1ab   : > { %s825_s20 = smov %s649_s22  ;;  %20 = sbr.rel (!%p18_p10) target bundleno = 7 (0x7), region = 80 }
 0x1b0   :  { %363 = vsyncpa [#allocation5], 1 }
 0x1b1   :  { %365 = vsyncpa [#allocation5 + $0x1], 1 }
 0x1b2   :  { %366 = vsyncpa [#allocation6], 1 }
 0x1b3   :  { %368 = vsyncpa [#allocation6 + $0x1], 1 }

</bundles_post_ra>
